<compile_context>
chip_gen: v7x
topology: tpu7x:2x2x1
jax: 0.10.0
libtpu: 0.0.40
codegen_flags: <defaults>
</compile_context>

<pallas_src>
import functools

import jax
import jax.numpy as jnp
from jax import lax
from jax.experimental import pallas as pl
from jax.experimental.pallas import tpu as pltpu

PACK = 128  # lane-dense packed output width: [h_m_new (M) | out (O) | zeros]


def lmn_chunk_kernel(xproj_ref, hm0_ref, whm_ref, wfo_ref, bpk_ref,
                     y_ref, hm_scr, *, TT, M):
    c = pl.program_id(0)

    # Initialise the carried memory state from the provided h_m at chunk 0.
    @pl.when(c == 0)
    def _():
        hm_scr[...] = hm0_ref[...]

    # Hoist weight / bias loads out of the unrolled time loop.
    whm = whm_ref[...]        # (M, PACK + H)  = [Wm | 0 | W1h]
    wfo = wfo_ref[...]        # (H, PACK)      = [Wf | Wout | 0]
    bpk = bpk_ref[...]        # (1, PACK)      = [bm+bf | bout | 0]

    def step(t, h_m):
        # (B, M) @ (M, PACK+H) -> (B, PACK+H); f32 operands + f32 accumulation.
        hm_proj = jnp.dot(h_m, whm, preferred_element_type=jnp.float32)
        # MLP hidden layer on concat(x, h_m): x-part precomputed outside.
        h_f = jnp.tanh(xproj_ref[t] + hm_proj[:, PACK:])           # (B, H)
        # Fused h_f matmul + aligned add of the h_m contribution + biases.
        y_packed = (jnp.dot(h_f, wfo, preferred_element_type=jnp.float32)
                    + hm_proj[:, :PACK] + bpk)                     # (B, PACK)
        # Single unmasked 128-lane store: [h_m_new | out | zeros].
        y_ref[t] = y_packed
        return y_packed[:, :M]                                     # next h_m

    # Carry h_m in vregs across the chunk; spill to VMEM only at the boundary.
    hm_scr[...] = lax.fori_loop(0, TT, step, hm_scr[...], unroll=True)


def pack_params(params):
    H = params["w1x"].shape[1]
    M = params["wm"].shape[1]
    O = params["wout"].shape[1]
    assert M + O <= PACK

    # [Wm | zeros(O..PACK) | W1h]  so (h_m @ whm)[:, :PACK] aligns with y_packed
    # and (h_m @ whm)[:, PACK:] is the hidden-layer contribution.
    whm = jnp.zeros((M, PACK + H), jnp.float32)
    whm = whm.at[:, :M].set(params["wm"]).at[:, PACK:].set(params["w1h"])

    wfo = jnp.zeros((H, PACK), jnp.float32)
    wfo = wfo.at[:, :M].set(params["wf"]).at[:, M:M + O].set(params["wout"])

    bpk = jnp.zeros((1, PACK), jnp.float32)
    bpk = bpk.at[:, :M].set(params["bm"] + params["bf"])
    bpk = bpk.at[:, M:M + O].set(params["bout"])

    return dict(whm=whm, wfo=wfo, bpk=bpk, H=H, M=M, O=O)


def lmn_forward_seq(x_seq, h_m0, params, *, time_chunk=8):
    """Runs the LMN recurrence over a (T, B, I) input sequence.

    Returns (h_m_seq (T,B,M), out_seq (T,B,O)); h_m_seq[-1] is the final state.
    """
    T, B, _ = x_seq.shape
    pk = pack_params(params)
    H, M, O = pk["H"], pk["M"], pk["O"]

    # Hoisted input projection: one large batched matmul outside the recurrence.
    xproj = (jnp.einsum("tbi,ih->tbh", x_seq, params["w1x"])
             + params["b1"]).astype(jnp.float32)                  # (T, B, H)

    # Pad batch to the f32 sublane granularity and time to a chunk multiple.
    TT = min(time_chunk, T)
    B_pad = ((B + 7) // 8) * 8
    T_pad = ((T + TT - 1) // TT) * TT
    xproj_p = jnp.zeros((T_pad, B_pad, H), jnp.float32).at[:T, :B].set(xproj)
    hm0_p = jnp.zeros((B_pad, M), jnp.float32).at[:B].set(h_m0)

    kernel = functools.partial(lmn_chunk_kernel, TT=TT, M=M)

    y = pl.pallas_call(
        kernel,
        out_shape=jax.ShapeDtypeStruct((T_pad, B_pad, PACK), jnp.float32),
        grid=(T_pad // TT,),
        in_specs=[
            pl.BlockSpec((TT, B_pad, H), lambda c: (c, 0, 0)),   # xproj, streamed per chunk
            pl.BlockSpec((B_pad, M), lambda c: (0, 0)),          # h_m0, resident
            pl.BlockSpec((M, PACK + H), lambda c: (0, 0)),       # [Wm | 0 | W1h], resident
            pl.BlockSpec((H, PACK), lambda c: (0, 0)),           # [Wf | Wout | 0], resident
            pl.BlockSpec((1, PACK), lambda c: (0, 0)),           # [bm+bf | bout | 0], resident
        ],
        out_specs=pl.BlockSpec((TT, B_pad, PACK), lambda c: (c, 0, 0)),
        scratch_shapes=[pltpu.VMEM((B_pad, M), jnp.float32)],    # h_m across chunks
        compiler_params=pltpu.CompilerParams(
            dimension_semantics=("arbitrary",),                  # time is a recurrence
        ),
    )(xproj_p, hm0_p, pk["whm"], pk["wfo"], pk["bpk"])

    return y[:T, :B, :M], y[:T, :B, M:M + O]


def make_params(key, input_size, hidden_size, output_size, memory_size):
    # Deterministic synthetic parameters (not loading a checkpoint).
    ks = jax.random.split(key, 8)
    scale = 0.05
    w1 = scale * jax.random.normal(
        ks[0], (input_size + memory_size, hidden_size), jnp.float32)
    return {
        "w1x": w1[:input_size, :],
        "w1h": w1[input_size:, :],
        "b1": scale * jax.random.normal(ks[1], (1, hidden_size), jnp.float32),
        "wout": scale * jax.random.normal(ks[2], (hidden_size, output_size), jnp.float32),
        "bout": scale * jax.random.normal(ks[3], (1, output_size), jnp.float32),
        "wm": scale * jax.random.normal(ks[4], (memory_size, memory_size), jnp.float32),
        "bm": scale * jax.random.normal(ks[5], (1, memory_size), jnp.float32),
        "wf": scale * jax.random.normal(ks[6], (hidden_size, memory_size), jnp.float32),
        "bf": scale * jax.random.normal(ks[7], (1, memory_size), jnp.float32),
    }


def lmn_forward_ref_f32(x_seq, h_m0, p):
    """Pure f32 JAX reference replicating the original module semantics."""
    def step(h_m, x_t):
        h_f = jnp.tanh(x_t @ p["w1x"] + h_m @ p["w1h"] + p["b1"])
        out = h_f @ p["wout"] + p["bout"]
        h_m_new = (h_m @ p["wm"] + p["bm"]) + (h_f @ p["wf"] + p["bf"])
        return h_m_new, (h_m_new, out)
    _, (hm_seq, out_seq) = lax.scan(step, h_m0, x_seq)
    return hm_seq, out_seq


if __name__ == "__main__":
    # Small shapes consistent with the module's forward.
    batch = 2
    input_size = 16
    hidden_size = 32   # hidden_sizes = [32]
    output_size = 8
    memory_size = 32
    seq_len = 8

    key = jax.random.PRNGKey(0)
    kx, khm, kp = jax.random.split(key, 3)
    x_seq = jax.random.normal(kx, (seq_len, batch, input_size), jnp.float32)
    h_m0 = jax.random.normal(khm, (batch, memory_size), jnp.float32)
    params = make_params(kp, input_size, hidden_size, output_size, memory_size)

    hm_seq, out_seq = lmn_forward_seq(x_seq, h_m0, params)
    hm_seq = jax.block_until_ready(hm_seq)
    out_seq = jax.block_until_ready(out_seq)

    assert hm_seq.shape == (seq_len, batch, memory_size)
    assert out_seq.shape == (seq_len, batch, output_size)

    # Check against the full-f32 module semantics (kernel is f32 end-to-end;
    # tolerance covers matmul-precision differences between XLA and Mosaic).
    hm_f32, out_f32 = lmn_forward_ref_f32(x_seq, h_m0, params)
    assert jnp.allclose(hm_seq, hm_f32, atol=2e-2, rtol=2e-2)
    assert jnp.allclose(out_seq, out_f32, atol=2e-2, rtol=2e-2)

    print("KERNEL_OK")
</pallas_src>

<mosaic_0001>
module attributes {stable_mosaic.version = 11 : i64} {
  func.func @lmn_chunk_kernel(%arg0: i32, %arg1: memref<8x8x32xf32, #tpu.memory_space<vmem>>, %arg2: memref<8x32xf32, #tpu.memory_space<vmem>>, %arg3: memref<32x160xf32, #tpu.memory_space<vmem>>, %arg4: memref<32x128xf32, #tpu.memory_space<vmem>>, %arg5: memref<1x128xf32, #tpu.memory_space<vmem>>, %arg6: memref<8x8x128xf32, #tpu.memory_space<vmem>>, %arg7: memref<8x32xf32, #tpu.memory_space<vmem>>) attributes {dimension_semantics = [#tpu.dimension_semantics<arbitrary>], iteration_bounds = array<i64: 1>, scalar_prefetch = 0 : i64, scratch_operands = 1 : i64, tpu.core_type = #tpu.core_type<tc>, window_params = [{transform_indices = @transform_0, window_bounds = array<i64: 8, 8, 32>}, {pipeline_mode = #tpu.pipeline_mode<synchronous>, transform_indices = @transform_1, window_bounds = array<i64: 8, 32>}, {pipeline_mode = #tpu.pipeline_mode<synchronous>, transform_indices = @transform_2, window_bounds = array<i64: 32, 160>}, {pipeline_mode = #tpu.pipeline_mode<synchronous>, transform_indices = @transform_3, window_bounds = array<i64: 32, 128>}, {pipeline_mode = #tpu.pipeline_mode<synchronous>, transform_indices = @transform_4, window_bounds = array<i64: 1, 128>}, {transform_indices = @transform_5, window_bounds = array<i64: 8, 8, 128>}]} {
    %c0_i32 = arith.constant 0 : i32
    %0 = arith.cmpi eq, %arg0, %c0_i32 : i32
    %1 = arith.extui %0 : i1 to i32
    %c0_i32_0 = arith.constant 0 : i32
    %2 = arith.cmpi ne, %1, %c0_i32_0 : i32
    scf.if %2 {
      %c0_58 = arith.constant 0 : index
      %c0_59 = arith.constant 0 : index
      %144 = vector.load %arg2[%c0_58, %c0_59] : memref<8x32xf32, #tpu.memory_space<vmem>>, vector<8x32xf32>
      %c0_60 = arith.constant 0 : index
      %c0_61 = arith.constant 0 : index
      %145 = vector.load %arg7[%c0_60, %c0_61] : memref<8x32xf32, #tpu.memory_space<vmem>>, vector<8x32xf32>
      tpu.vector_store %arg7[%c0_60, %c0_61], %144 {strides = array<i32>} : memref<8x32xf32, #tpu.memory_space<vmem>>, vector<8x32xf32>,
    } else {
    }
    %c0 = arith.constant 0 : index
    %c0_1 = arith.constant 0 : index
    %3 = vector.load %arg3[%c0, %c0_1] : memref<32x160xf32, #tpu.memory_space<vmem>>, vector<32x160xf32>
    %c0_2 = arith.constant 0 : index
    %c0_3 = arith.constant 0 : index
    %4 = vector.load %arg4[%c0_2, %c0_3] : memref<32x128xf32, #tpu.memory_space<vmem>>, vector<32x128xf32>
    %c0_4 = arith.constant 0 : index
    %c0_5 = arith.constant 0 : index
    %5 = vector.load %arg5[%c0_4, %c0_5] : memref<1x128xf32, #tpu.memory_space<vmem>>, vector<1x128xf32>
    %c0_6 = arith.constant 0 : index
    %c0_7 = arith.constant 0 : index
    %6 = vector.load %arg7[%c0_6, %c0_7] : memref<8x32xf32, #tpu.memory_space<vmem>>, vector<8x32xf32>
    %c0_i32_8 = arith.constant 0 : i32
    %cst = arith.constant dense<0.000000e+00> : vector<8x160xf32>
    %7 = tpu.matmul %6, %3, %cst {dimension_numbers = #tpu.dot_dimension_numbers<[1], [0], [0], [1], [0, 0, 1, 1], [], []>} : vector<8x32xf32>, vector<32x160xf32>, vector<8x160xf32> -> vector<8x160xf32>
    %8 = arith.index_cast %c0_i32_8 : i32 to index
    %c0_9 = arith.constant 0 : index
    %c0_10 = arith.constant 0 : index
    %9 = vector.load %arg1[%8, %c0_9, %c0_10] : memref<8x8x32xf32, #tpu.memory_space<vmem>>, vector<1x8x32xf32>
    %10 = vector.shape_cast %9 : vector<1x8x32xf32> to vector<8x32xf32>
    %11 = vector.extract_strided_slice %7 {offsets = [0, 128], sizes = [8, 32], strides = [1, 1]} : vector<8x160xf32> to vector<8x32xf32>
    %12 = arith.addf %10, %11 : vector<8x32xf32>
    %13 = math.tanh %12 : vector<8x32xf32>
    %cst_11 = arith.constant dense<0.000000e+00> : vector<8x128xf32>
    %14 = tpu.matmul %13, %4, %cst_11 {dimension_numbers = #tpu.dot_dimension_numbers<[1], [0], [0], [1], [0, 0, 1, 1], [], []>} : vector<8x32xf32>, vector<32x128xf32>, vector<8x128xf32> -> vector<8x128xf32>
    %15 = vector.extract_strided_slice %7 {offsets = [0, 0], sizes = [8, 128], strides = [1, 1]} : vector<8x160xf32> to vector<8x128xf32>
    %16 = arith.addf %14, %15 : vector<8x128xf32>
    %17 = vector.broadcast %5 : vector<1x128xf32> to vector<8x128xf32>
    %18 = arith.addf %16, %17 : vector<8x128xf32>
    %19 = arith.index_cast %c0_i32_8 : i32 to index
    %c0_12 = arith.constant 0 : index
    %c0_13 = arith.constant 0 : index
    %20 = vector.load %arg6[%19, %c0_12, %c0_13] : memref<8x8x128xf32, #tpu.memory_space<vmem>>, vector<1x8x128xf32>
    %21 = vector.shape_cast %20 : vector<1x8x128xf32> to vector<8x128xf32>
    %22 = vector.shape_cast %18 : vector<8x128xf32> to vector<1x8x128xf32>
    tpu.vector_store %arg6[%19, %c0_12, %c0_13], %22 {strides = array<i32>} : memref<8x8x128xf32, #tpu.memory_space<vmem>>, vector<1x8x128xf32>,
    %23 = vector.extract_strided_slice %18 {offsets = [0, 0], sizes = [8, 32], strides = [1, 1]} : vector<8x128xf32> to vector<8x32xf32>
    %c1_i32 = arith.constant 1 : i32
    %cst_14 = arith.constant dense<0.000000e+00> : vector<8x160xf32>
    %24 = tpu.matmul %23, %3, %cst_14 {dimension_numbers = #tpu.dot_dimension_numbers<[1], [0], [0], [1], [0, 0, 1, 1], [], []>} : vector<8x32xf32>, vector<32x160xf32>, vector<8x160xf32> -> vector<8x160xf32>
    %25 = arith.index_cast %c1_i32 : i32 to index
    %c0_15 = arith.constant 0 : index
    %c0_16 = arith.constant 0 : index
    %26 = vector.load %arg1[%25, %c0_15, %c0_16] : memref<8x8x32xf32, #tpu.memory_space<vmem>>, vector<1x8x32xf32>
    %27 = vector.shape_cast %26 : vector<1x8x32xf32> to vector<8x32xf32>
    %28 = vector.extract_strided_slice %24 {offsets = [0, 128], sizes = [8, 32], strides = [1, 1]} : vector<8x160xf32> to vector<8x32xf32>
    %29 = arith.addf %27, %28 : vector<8x32xf32>
    %30 = math.tanh %29 : vector<8x32xf32>
    %cst_17 = arith.constant dense<0.000000e+00> : vector<8x128xf32>
    %31 = tpu.matmul %30, %4, %cst_17 {dimension_numbers = #tpu.dot_dimension_numbers<[1], [0], [0], [1], [0, 0, 1, 1], [], []>} : vector<8x32xf32>, vector<32x128xf32>, vector<8x128xf32> -> vector<8x128xf32>
    %32 = vector.extract_strided_slice %24 {offsets = [0, 0], sizes = [8, 128], strides = [1, 1]} : vector<8x160xf32> to vector<8x128xf32>
    %33 = arith.addf %31, %32 : vector<8x128xf32>
    %34 = vector.broadcast %5 : vector<1x128xf32> to vector<8x128xf32>
    %35 = arith.addf %33, %34 : vector<8x128xf32>
    %36 = arith.index_cast %c1_i32 : i32 to index
    %c0_18 = arith.constant 0 : index
    %c0_19 = arith.constant 0 : index
    %37 = vector.load %arg6[%36, %c0_18, %c0_19] : memref<8x8x128xf32, #tpu.memory_space<vmem>>, vector<1x8x128xf32>
    %38 = vector.shape_cast %37 : vector<1x8x128xf32> to vector<8x128xf32>
    %39 = vector.shape_cast %35 : vector<8x128xf32> to vector<1x8x128xf32>
    tpu.vector_store %arg6[%36, %c0_18, %c0_19], %39 {strides = array<i32>} : memref<8x8x128xf32, #tpu.memory_space<vmem>>, vector<1x8x128xf32>,
    %40 = vector.extract_strided_slice %35 {offsets = [0, 0], sizes = [8, 32], strides = [1, 1]} : vector<8x128xf32> to vector<8x32xf32>
    %c2_i32 = arith.constant 2 : i32
    %cst_20 = arith.constant dense<0.000000e+00> : vector<8x160xf32>
    %41 = tpu.matmul %40, %3, %cst_20 {dimension_numbers = #tpu.dot_dimension_numbers<[1], [0], [0], [1], [0, 0, 1, 1], [], []>} : vector<8x32xf32>, vector<32x160xf32>, vector<8x160xf32> -> vector<8x160xf32>
    %42 = arith.index_cast %c2_i32 : i32 to index
    %c0_21 = arith.constant 0 : index
    %c0_22 = arith.constant 0 : index
    %43 = vector.load %arg1[%42, %c0_21, %c0_22] : memref<8x8x32xf32, #tpu.memory_space<vmem>>, vector<1x8x32xf32>
    %44 = vector.shape_cast %43 : vector<1x8x32xf32> to vector<8x32xf32>
    %45 = vector.extract_strided_slice %41 {offsets = [0, 128], sizes = [8, 32], strides = [1, 1]} : vector<8x160xf32> to vector<8x32xf32>
    %46 = arith.addf %44, %45 : vector<8x32xf32>
    %47 = math.tanh %46 : vector<8x32xf32>
    %cst_23 = arith.constant dense<0.000000e+00> : vector<8x128xf32>
    %48 = tpu.matmul %47, %4, %cst_23 {dimension_numbers = #tpu.dot_dimension_numbers<[1], [0], [0], [1], [0, 0, 1, 1], [], []>} : vector<8x32xf32>, vector<32x128xf32>, vector<8x128xf32> -> vector<8x128xf32>
    %49 = vector.extract_strided_slice %41 {offsets = [0, 0], sizes = [8, 128], strides = [1, 1]} : vector<8x160xf32> to vector<8x128xf32>
    %50 = arith.addf %48, %49 : vector<8x128xf32>
    %51 = vector.broadcast %5 : vector<1x128xf32> to vector<8x128xf32>
    %52 = arith.addf %50, %51 : vector<8x128xf32>
    %53 = arith.index_cast %c2_i32 : i32 to index
    %c0_24 = arith.constant 0 : index
    %c0_25 = arith.constant 0 : index
    %54 = vector.load %arg6[%53, %c0_24, %c0_25] : memref<8x8x128xf32, #tpu.memory_space<vmem>>, vector<1x8x128xf32>
    %55 = vector.shape_cast %54 : vector<1x8x128xf32> to vector<8x128xf32>
    %56 = vector.shape_cast %52 : vector<8x128xf32> to vector<1x8x128xf32>
    tpu.vector_store %arg6[%53, %c0_24, %c0_25], %56 {strides = array<i32>} : memref<8x8x128xf32, #tpu.memory_space<vmem>>, vector<1x8x128xf32>,
    %57 = vector.extract_strided_slice %52 {offsets = [0, 0], sizes = [8, 32], strides = [1, 1]} : vector<8x128xf32> to vector<8x32xf32>
    %c3_i32 = arith.constant 3 : i32
    %cst_26 = arith.constant dense<0.000000e+00> : vector<8x160xf32>
    %58 = tpu.matmul %57, %3, %cst_26 {dimension_numbers = #tpu.dot_dimension_numbers<[1], [0], [0], [1], [0, 0, 1, 1], [], []>} : vector<8x32xf32>, vector<32x160xf32>, vector<8x160xf32> -> vector<8x160xf32>
    %59 = arith.index_cast %c3_i32 : i32 to index
    %c0_27 = arith.constant 0 : index
    %c0_28 = arith.constant 0 : index
    %60 = vector.load %arg1[%59, %c0_27, %c0_28] : memref<8x8x32xf32, #tpu.memory_space<vmem>>, vector<1x8x32xf32>
    %61 = vector.shape_cast %60 : vector<1x8x32xf32> to vector<8x32xf32>
    %62 = vector.extract_strided_slice %58 {offsets = [0, 128], sizes = [8, 32], strides = [1, 1]} : vector<8x160xf32> to vector<8x32xf32>
    %63 = arith.addf %61, %62 : vector<8x32xf32>
    %64 = math.tanh %63 : vector<8x32xf32>
    %cst_29 = arith.constant dense<0.000000e+00> : vector<8x128xf32>
    %65 = tpu.matmul %64, %4, %cst_29 {dimension_numbers = #tpu.dot_dimension_numbers<[1], [0], [0], [1], [0, 0, 1, 1], [], []>} : vector<8x32xf32>, vector<32x128xf32>, vector<8x128xf32> -> vector<8x128xf32>
    %66 = vector.extract_strided_slice %58 {offsets = [0, 0], sizes = [8, 128], strides = [1, 1]} : vector<8x160xf32> to vector<8x128xf32>
    %67 = arith.addf %65, %66 : vector<8x128xf32>
    %68 = vector.broadcast %5 : vector<1x128xf32> to vector<8x128xf32>
    %69 = arith.addf %67, %68 : vector<8x128xf32>
    %70 = arith.index_cast %c3_i32 : i32 to index
    %c0_30 = arith.constant 0 : index
    %c0_31 = arith.constant 0 : index
    %71 = vector.load %arg6[%70, %c0_30, %c0_31] : memref<8x8x128xf32, #tpu.memory_space<vmem>>, vector<1x8x128xf32>
    %72 = vector.shape_cast %71 : vector<1x8x128xf32> to vector<8x128xf32>
    %73 = vector.shape_cast %69 : vector<8x128xf32> to vector<1x8x128xf32>
    tpu.vector_store %arg6[%70, %c0_30, %c0_31], %73 {strides = array<i32>} : memref<8x8x128xf32, #tpu.memory_space<vmem>>, vector<1x8x128xf32>,
    %74 = vector.extract_strided_slice %69 {offsets = [0, 0], sizes = [8, 32], strides = [1, 1]} : vector<8x128xf32> to vector<8x32xf32>
    %c4_i32 = arith.constant 4 : i32
    %cst_32 = arith.constant dense<0.000000e+00> : vector<8x160xf32>
    %75 = tpu.matmul %74, %3, %cst_32 {dimension_numbers = #tpu.dot_dimension_numbers<[1], [0], [0], [1], [0, 0, 1, 1], [], []>} : vector<8x32xf32>, vector<32x160xf32>, vector<8x160xf32> -> vector<8x160xf32>
    %76 = arith.index_cast %c4_i32 : i32 to index
    %c0_33 = arith.constant 0 : index
    %c0_34 = arith.constant 0 : index
    %77 = vector.load %arg1[%76, %c0_33, %c0_34] : memref<8x8x32xf32, #tpu.memory_space<vmem>>, vector<1x8x32xf32>
    %78 = vector.shape_cast %77 : vector<1x8x32xf32> to vector<8x32xf32>
    %79 = vector.extract_strided_slice %75 {offsets = [0, 128], sizes = [8, 32], strides = [1, 1]} : vector<8x160xf32> to vector<8x32xf32>
    %80 = arith.addf %78, %79 : vector<8x32xf32>
    %81 = math.tanh %80 : vector<8x32xf32>
    %cst_35 = arith.constant dense<0.000000e+00> : vector<8x128xf32>
    %82 = tpu.matmul %81, %4, %cst_35 {dimension_numbers = #tpu.dot_dimension_numbers<[1], [0], [0], [1], [0, 0, 1, 1], [], []>} : vector<8x32xf32>, vector<32x128xf32>, vector<8x128xf32> -> vector<8x128xf32>
    %83 = vector.extract_strided_slice %75 {offsets = [0, 0], sizes = [8, 128], strides = [1, 1]} : vector<8x160xf32> to vector<8x128xf32>
    %84 = arith.addf %82, %83 : vector<8x128xf32>
    %85 = vector.broadcast %5 : vector<1x128xf32> to vector<8x128xf32>
    %86 = arith.addf %84, %85 : vector<8x128xf32>
    %87 = arith.index_cast %c4_i32 : i32 to index
    %c0_36 = arith.constant 0 : index
    %c0_37 = arith.constant 0 : index
    %88 = vector.load %arg6[%87, %c0_36, %c0_37] : memref<8x8x128xf32, #tpu.memory_space<vmem>>, vector<1x8x128xf32>
    %89 = vector.shape_cast %88 : vector<1x8x128xf32> to vector<8x128xf32>
    %90 = vector.shape_cast %86 : vector<8x128xf32> to vector<1x8x128xf32>
    tpu.vector_store %arg6[%87, %c0_36, %c0_37], %90 {strides = array<i32>} : memref<8x8x128xf32, #tpu.memory_space<vmem>>, vector<1x8x128xf32>,
    %91 = vector.extract_strided_slice %86 {offsets = [0, 0], sizes = [8, 32], strides = [1, 1]} : vector<8x128xf32> to vector<8x32xf32>
    %c5_i32 = arith.constant 5 : i32
    %cst_38 = arith.constant dense<0.000000e+00> : vector<8x160xf32>
    %92 = tpu.matmul %91, %3, %cst_38 {dimension_numbers = #tpu.dot_dimension_numbers<[1], [0], [0], [1], [0, 0, 1, 1], [], []>} : vector<8x32xf32>, vector<32x160xf32>, vector<8x160xf32> -> vector<8x160xf32>
    %93 = arith.index_cast %c5_i32 : i32 to index
    %c0_39 = arith.constant 0 : index
    %c0_40 = arith.constant 0 : index
    %94 = vector.load %arg1[%93, %c0_39, %c0_40] : memref<8x8x32xf32, #tpu.memory_space<vmem>>, vector<1x8x32xf32>
    %95 = vector.shape_cast %94 : vector<1x8x32xf32> to vector<8x32xf32>
    %96 = vector.extract_strided_slice %92 {offsets = [0, 128], sizes = [8, 32], strides = [1, 1]} : vector<8x160xf32> to vector<8x32xf32>
    %97 = arith.addf %95, %96 : vector<8x32xf32>
    %98 = math.tanh %97 : vector<8x32xf32>
    %cst_41 = arith.constant dense<0.000000e+00> : vector<8x128xf32>
    %99 = tpu.matmul %98, %4, %cst_41 {dimension_numbers = #tpu.dot_dimension_numbers<[1], [0], [0], [1], [0, 0, 1, 1], [], []>} : vector<8x32xf32>, vector<32x128xf32>, vector<8x128xf32> -> vector<8x128xf32>
    %100 = vector.extract_strided_slice %92 {offsets = [0, 0], sizes = [8, 128], strides = [1, 1]} : vector<8x160xf32> to vector<8x128xf32>
    %101 = arith.addf %99, %100 : vector<8x128xf32>
    %102 = vector.broadcast %5 : vector<1x128xf32> to vector<8x128xf32>
    %103 = arith.addf %101, %102 : vector<8x128xf32>
    %104 = arith.index_cast %c5_i32 : i32 to index
    %c0_42 = arith.constant 0 : index
    %c0_43 = arith.constant 0 : index
    %105 = vector.load %arg6[%104, %c0_42, %c0_43] : memref<8x8x128xf32, #tpu.memory_space<vmem>>, vector<1x8x128xf32>
    %106 = vector.shape_cast %105 : vector<1x8x128xf32> to vector<8x128xf32>
    %107 = vector.shape_cast %103 : vector<8x128xf32> to vector<1x8x128xf32>
    tpu.vector_store %arg6[%104, %c0_42, %c0_43], %107 {strides = array<i32>} : memref<8x8x128xf32, #tpu.memory_space<vmem>>, vector<1x8x128xf32>,
    %108 = vector.extract_strided_slice %103 {offsets = [0, 0], sizes = [8, 32], strides = [1, 1]} : vector<8x128xf32> to vector<8x32xf32>
    %c6_i32 = arith.constant 6 : i32
    %cst_44 = arith.constant dense<0.000000e+00> : vector<8x160xf32>
    %109 = tpu.matmul %108, %3, %cst_44 {dimension_numbers = #tpu.dot_dimension_numbers<[1], [0], [0], [1], [0, 0, 1, 1], [], []>} : vector<8x32xf32>, vector<32x160xf32>, vector<8x160xf32> -> vector<8x160xf32>
    %110 = arith.index_cast %c6_i32 : i32 to index
    %c0_45 = arith.constant 0 : index
    %c0_46 = arith.constant 0 : index
    %111 = vector.load %arg1[%110, %c0_45, %c0_46] : memref<8x8x32xf32, #tpu.memory_space<vmem>>, vector<1x8x32xf32>
    %112 = vector.shape_cast %111 : vector<1x8x32xf32> to vector<8x32xf32>
    %113 = vector.extract_strided_slice %109 {offsets = [0, 128], sizes = [8, 32], strides = [1, 1]} : vector<8x160xf32> to vector<8x32xf32>
    %114 = arith.addf %112, %113 : vector<8x32xf32>
    %115 = math.tanh %114 : vector<8x32xf32>
    %cst_47 = arith.constant dense<0.000000e+00> : vector<8x128xf32>
    %116 = tpu.matmul %115, %4, %cst_47 {dimension_numbers = #tpu.dot_dimension_numbers<[1], [0], [0], [1], [0, 0, 1, 1], [], []>} : vector<8x32xf32>, vector<32x128xf32>, vector<8x128xf32> -> vector<8x128xf32>
    %117 = vector.extract_strided_slice %109 {offsets = [0, 0], sizes = [8, 128], strides = [1, 1]} : vector<8x160xf32> to vector<8x128xf32>
    %118 = arith.addf %116, %117 : vector<8x128xf32>
    %119 = vector.broadcast %5 : vector<1x128xf32> to vector<8x128xf32>
    %120 = arith.addf %118, %119 : vector<8x128xf32>
    %121 = arith.index_cast %c6_i32 : i32 to index
    %c0_48 = arith.constant 0 : index
    %c0_49 = arith.constant 0 : index
    %122 = vector.load %arg6[%121, %c0_48, %c0_49] : memref<8x8x128xf32, #tpu.memory_space<vmem>>, vector<1x8x128xf32>
    %123 = vector.shape_cast %122 : vector<1x8x128xf32> to vector<8x128xf32>
    %124 = vector.shape_cast %120 : vector<8x128xf32> to vector<1x8x128xf32>
    tpu.vector_store %arg6[%121, %c0_48, %c0_49], %124 {strides = array<i32>} : memref<8x8x128xf32, #tpu.memory_space<vmem>>, vector<1x8x128xf32>,
    %125 = vector.extract_strided_slice %120 {offsets = [0, 0], sizes = [8, 32], strides = [1, 1]} : vector<8x128xf32> to vector<8x32xf32>
    %c7_i32 = arith.constant 7 : i32
    %cst_50 = arith.constant dense<0.000000e+00> : vector<8x160xf32>
    %126 = tpu.matmul %125, %3, %cst_50 {dimension_numbers = #tpu.dot_dimension_numbers<[1], [0], [0], [1], [0, 0, 1, 1], [], []>} : vector<8x32xf32>, vector<32x160xf32>, vector<8x160xf32> -> vector<8x160xf32>
    %127 = arith.index_cast %c7_i32 : i32 to index
    %c0_51 = arith.constant 0 : index
    %c0_52 = arith.constant 0 : index
    %128 = vector.load %arg1[%127, %c0_51, %c0_52] : memref<8x8x32xf32, #tpu.memory_space<vmem>>, vector<1x8x32xf32>
    %129 = vector.shape_cast %128 : vector<1x8x32xf32> to vector<8x32xf32>
    %130 = vector.extract_strided_slice %126 {offsets = [0, 128], sizes = [8, 32], strides = [1, 1]} : vector<8x160xf32> to vector<8x32xf32>
    %131 = arith.addf %129, %130 : vector<8x32xf32>
    %132 = math.tanh %131 : vector<8x32xf32>
    %cst_53 = arith.constant dense<0.000000e+00> : vector<8x128xf32>
    %133 = tpu.matmul %132, %4, %cst_53 {dimension_numbers = #tpu.dot_dimension_numbers<[1], [0], [0], [1], [0, 0, 1, 1], [], []>} : vector<8x32xf32>, vector<32x128xf32>, vector<8x128xf32> -> vector<8x128xf32>
    %134 = vector.extract_strided_slice %126 {offsets = [0, 0], sizes = [8, 128], strides = [1, 1]} : vector<8x160xf32> to vector<8x128xf32>
    %135 = arith.addf %133, %134 : vector<8x128xf32>
    %136 = vector.broadcast %5 : vector<1x128xf32> to vector<8x128xf32>
    %137 = arith.addf %135, %136 : vector<8x128xf32>
    %138 = arith.index_cast %c7_i32 : i32 to index
    %c0_54 = arith.constant 0 : index
    %c0_55 = arith.constant 0 : index
    %139 = vector.load %arg6[%138, %c0_54, %c0_55] : memref<8x8x128xf32, #tpu.memory_space<vmem>>, vector<1x8x128xf32>
    %140 = vector.shape_cast %139 : vector<1x8x128xf32> to vector<8x128xf32>
    %141 = vector.shape_cast %137 : vector<8x128xf32> to vector<1x8x128xf32>
    tpu.vector_store %arg6[%138, %c0_54, %c0_55], %141 {strides = array<i32>} : memref<8x8x128xf32, #tpu.memory_space<vmem>>, vector<1x8x128xf32>,
    %142 = vector.extract_strided_slice %137 {offsets = [0, 0], sizes = [8, 32], strides = [1, 1]} : vector<8x128xf32> to vector<8x32xf32>
    %c8_i32 = arith.constant 8 : i32
    %c0_56 = arith.constant 0 : index
    %c0_57 = arith.constant 0 : index
    %143 = vector.load %arg7[%c0_56, %c0_57] : memref<8x32xf32, #tpu.memory_space<vmem>>, vector<8x32xf32>
    tpu.vector_store %arg7[%c0_56, %c0_57], %142 {strides = array<i32>} : memref<8x32xf32, #tpu.memory_space<vmem>>, vector<8x32xf32>,
    return
  }
  func.func @transform_0(%arg0: i32) -> (i32, i32, i32) {
    %c0_i32 = arith.constant 0 : i32
    %c0_i32_0 = arith.constant 0 : i32
    %c0_i32_1 = arith.constant 0 : i32
    return %arg0, %c0_i32, %c0_i32_0 : i32, i32, i32
  }
  func.func @transform_1(%arg0: i32) -> (i32, i32) {
    %c0_i32 = arith.constant 0 : i32
    %c0_i32_0 = arith.constant 0 : i32
    %c0_i32_1 = arith.constant 0 : i32
    return %c0_i32, %c0_i32_0 : i32, i32
  }
  func.func @transform_2(%arg0: i32) -> (i32, i32) {
    %c0_i32 = arith.constant 0 : i32
    %c0_i32_0 = arith.constant 0 : i32
    %c0_i32_1 = arith.constant 0 : i32
    return %c0_i32, %c0_i32_0 : i32, i32
  }
  func.func @transform_3(%arg0: i32) -> (i32, i32) {
    %c0_i32 = arith.constant 0 : i32
    %c0_i32_0 = arith.constant 0 : i32
    %c0_i32_1 = arith.constant 0 : i32
    return %c0_i32, %c0_i32_0 : i32, i32
  }
  func.func @transform_4(%arg0: i32) -> (i32, i32) {
    %c0_i32 = arith.constant 0 : i32
    %c0_i32_0 = arith.constant 0 : i32
    %c0_i32_1 = arith.constant 0 : i32
    return %c0_i32, %c0_i32_0 : i32, i32
  }
  func.func @transform_5(%arg0: i32) -> (i32, i32, i32) {
    %c0_i32 = arith.constant 0 : i32
    %c0_i32_0 = arith.constant 0 : i32
    %c0_i32_1 = arith.constant 0 : i32
    return %arg0, %c0_i32, %c0_i32_0 : i32, i32, i32
  }
}

</mosaic_0001>

<bundles_post_ra>
// kernel: tpu_custom_call.1
= control target key start
LH: loop header
LB: loop body
LE: loop exit
PB: predicated region body
PF: predicated region fallthrough
CT: control target
= control target key end

     0   :  { %10 = vsyncpa [#allocation4], 0  ;;  %s2004_s0 = inlined_call_operand.hbm [shape: f32[8,8,32], index: 0, kind: input, shape index: {}]   ;;  %s2005_s1 = inlined_call_operand.hbm [shape: f32[8,32], index: 1, kind: input, shape index: {}]   ;;  %s2006_s2 = inlined_call_operand.hbm [shape: f32[32,160], index: 2, kind: input, shape index: {}]   ;;  %s2007_s3 = inlined_call_operand.hbm [shape: f32[32,128], index: 3, kind: input, shape index: {}]   ;;  %s2008_s4 = inlined_call_operand.vmem [shape: f32[1,128], index: 4, kind: input, shape index: {}]   ;;  %s2009_s5 = inlined_call_operand.hbm [shape: f32[8,8,128], index: 5, kind: output, shape index: {}]  }
   0x1   :  { %11 = vsyncpa [#allocation7], 0 }
   0x2   :  { %12 = vsyncpa [#allocation10], 0 }
   0x3   :  { %13 = vsyncpa [#allocation5], 0  ;;  %s1755_s18 = smov [#allocation6]   ;;  %s1756_s20 = smov [#allocation3]  }
   0x4   :  { %s32_s19 = sshll.u32 %s1755_s18, 4  ;;  %s19_s21 = sshll.u32 %s1756_s20, 4  ;;  %s33_s19 = int_to_ptr.vmem [resolvable:$true] %s32_s19  ;;  %s1797_s21 = int_to_ptr.vmem [resolvable:$true] %s19_s21 }
   0x5   :  { %s1637_s24 = scalar_lea.hbm %s2005_s1, 128 }
   0x6   :  { %p1638_p0 = scmp.ne.s32.totalorder %s2005_s1, %s1637_s24  ;;  %p1641_p1 = scmp.lt.u32.totalorder %s1637_s24, %s2005_s1 }
   0x8   :  { %p1643_p2 = pnand %p1641_p1, %p1638_p0 }
   0xa   :  { %1646 = shalt.err (!%p1643_p2)
}
   0xb   :  { %s1647_s29 = scalar_lea.vmem %s33_s19, 128  ;;  %p1652_p4 = scmp.lt.s32.totalorder %s33_s19, %s33_s19 }
   0xc   :  { %p1648_p3 = scmp.ne.s32.totalorder %s33_s19, %s1647_s29  ;;  %p1653_p5 = scmp.lt.s32.totalorder %s1647_s29, %s1647_s29 }
   0xe   :  { %p1654_p6 = por %p1653_p5, %p1652_p4 }
  0x10   :  { %p1655_p7 = pnand %p1654_p6, %p1648_p3 }
  0x12   :  { %1658 = shalt.err (!%p1655_p7)
}
  0x13   :  { %35 = dma.hbm_to_vmem [thread:$0]  %s2005_s1, 128, %s33_s19, [#allocation7]  }
  0x14   :  { %s1659_s9 = scalar_lea.hbm %s2004_s0, 1024 }
  0x15   :  { %p1660_p8 = scmp.ne.s32.totalorder %s2004_s0, %s1659_s9  ;;  %p1663_p9 = scmp.lt.u32.totalorder %s1659_s9, %s2004_s0 }
  0x17   :  { %p1665_p10 = pnand %p1663_p9, %p1660_p8 }
  0x19   :  { %1668 = shalt.err (!%p1665_p10)
}
  0x1a   :  { %s1669_s14 = scalar_lea.vmem %s1797_s21, 1024  ;;  %p1674_p12 = scmp.lt.s32.totalorder %s1797_s21, %s1797_s21 }
  0x1b   :  { %p1670_p11 = scmp.ne.s32.totalorder %s1797_s21, %s1669_s14  ;;  %p1675_p13 = scmp.lt.s32.totalorder %s1669_s14, %s1669_s14 }
  0x1d   :  { %p1676_p0 = por %p1675_p13, %p1674_p12 }
  0x1f   :  { %p1677_p1 = pnand %p1676_p0, %p1670_p11 }
  0x21   :  { %1680 = shalt.err (!%p1677_p1)
}
  0x22   :  { %s1757_s1 = smov 128   ;;  %s1758_s15 = smov 8  }
  0x23   :  { %25 = dma.hbm_to_vmem [thread:$0]  %s2004_s0, 1024, %s1797_s21, [#allocation4], %s1757_s1, %s1757_s1, %s1758_s15  }
  0x24   :  { %s1759_s18 = smov [#allocation8]   ;;  %s1681_s23 = scalar_lea.hbm %s2006_s2, 1024 }
  0x25   :  { %s41_s19 = sshll.u32 %s1759_s18, 4  ;;  %p1682_p2 = scmp.ne.s32.totalorder %s2006_s2, %s1681_s23  ;;  %s42_s19 = int_to_ptr.vmem [resolvable:$true] %s41_s19 }
  0x26   :  { %p1685_p3 = scmp.lt.u32.totalorder %s1681_s23, %s2006_s2 }
  0x28   :  { %p1687_p4 = pnand %p1685_p3, %p1682_p2 }
  0x2a   :  { %1690 = shalt.err (!%p1687_p4)
}
  0x2b   :  { %s1691_s28 = scalar_lea.vmem %s42_s19, 1024  ;;  %p1696_p6 = scmp.lt.s32.totalorder %s42_s19, %s42_s19 }
  0x2c   :  { %p1692_p5 = scmp.ne.s32.totalorder %s42_s19, %s1691_s28  ;;  %p1697_p7 = scmp.lt.s32.totalorder %s1691_s28, %s1691_s28 }
  0x2e   :  { %p1698_p8 = por %p1697_p7, %p1696_p6 }
  0x30   :  { %p1699_p9 = pnand %p1698_p8, %p1692_p5 }
  0x32   :  { %1702 = shalt.err (!%p1699_p9)
}
  0x33   :  { %s1760_s0 = smov 256   ;;  %s1761_s21 = smov 16  }
  0x34   :  { %47 = dma.hbm_to_vmem [thread:$0]  %s2006_s2, 1024, %s42_s19, [#allocation7], %s1760_s0, %s1760_s0, %s1761_s21  }
  0x35   :  { %s1762_s6 = smov [#allocation9]   ;;  %s1703_s10 = scalar_lea.hbm %s2007_s3, 512 }
  0x36   :  { %s53_s7 = sshll.u32 %s1762_s6, 4  ;;  %p1704_p10 = scmp.ne.s32.totalorder %s2007_s3, %s1703_s10  ;;  %s54_s7 = int_to_ptr.vmem [resolvable:$true] %s53_s7 }
  0x37   :  { %p1707_p11 = scmp.lt.u32.totalorder %s1703_s10, %s2007_s3 }
  0x39   :  { %p1709_p12 = pnand %p1707_p11, %p1704_p10 }
  0x3b   :  { %1712 = shalt.err (!%p1709_p12)
}
  0x3c   :  { %s1713_s16 = scalar_lea.vmem %s54_s7, 512  ;;  %p1718_p0 = scmp.lt.s32.totalorder %s54_s7, %s54_s7 }
  0x3d   :  { %p1714_p13 = scmp.ne.s32.totalorder %s54_s7, %s1713_s16  ;;  %p1719_p1 = scmp.lt.s32.totalorder %s1713_s16, %s1713_s16 }
  0x3f   :  { %p1720_p2 = por %p1719_p1, %p1718_p0 }
  0x41   :  { %p1721_p3 = pnand %p1720_p2, %p1714_p13 }
  0x43   :  { %1724 = shalt.err (!%p1721_p3)
}
  0x44   :  { %59 = dma.hbm_to_vmem [thread:$0]  %s2007_s3, 512, %s54_s7, [#allocation10], %s1757_s1, %s1757_s1, %s1758_s15  }
  0x45   :  { %1747 = dma.done.wait [#allocation4], 1024  }
  0x46   :  { %1748 = vsyncadd [#allocation4], 4294966272 }
  0x47   :  { %1749 = dma.done.wait [#allocation7], 1152  }
  0x48   :  { %1750 = vsyncadd [#allocation7], 4294966144 }
  0x49   :  { %1751 = dma.done.wait [#allocation10], 512  }
  0x4a   :  { %1752 = vsyncadd [#allocation10], 4294966784  ;;  %v1763_v0 = vmov 0.0   ;;  %v82_v1 = vld [vmem:[#allocation8 + $0x8] sm:$0xff]  ;;  %v84_v2 = vld [vmem:[#allocation8 + $0x18] sm:$0xff]  ;;  %vm79_vm0 = vcmask 261120  }
  0x4b   :  { %163 = vmatprep.mubr.f32.mxu0 %v1763_v0  ;;  %v81_v3 = vld [vmem:[#allocation8] sm:$0xff]  ;;  %v1859_v4 = vpack.c.bf16 %v84_v2, %v82_v1  ;;  %v83_v5 = vld [vmem:[#allocation8 + $0x10] sm:$0xff]  ;;  %v86_v6 = vld [vmem:[#allocation8 + $0x28] sm:$0xff]  ;;  %v1764_v18 = vmov 0.0|0.0   ;;  %vm1765_vm1 = vmmov 0  }
  0x4c   :  { %v88_v7 = vld [vmem:[#allocation8 + $0x38] sm:$0xff]  ;;  %v1861_v8 = vpack.c.bf16 %v83_v5, %v81_v3  ;;  %v85_v10 = vld [vmem:[#allocation8 + $0x20] sm:$0xff]  ;;  %v87_v11 = vld [vmem:[#allocation8 + $0x30] sm:$0xff]  ;;  %1505 = vmatprep.subr.bf16.mxu1 %v1764_v18  ;;  %1417 = vmatprep.mubr.msk.f32.mxu1 %vm1765_vm1, %v1763_v0 }
  0x4d   :  { %v1863_v9 = vpack.c.bf16 %v88_v7, %v86_v6  ;;  %v78_v12 = vld [vmem:[#allocation6] sm:$0xff]  ;;  %1498 = vmatprep.subr.bf16.mxu0 %v1859_v4  ;;  %v1868_v13 = vpack.c.bf16 %v87_v11, %v85_v10  ;;  %v89_v15 = vld [vmem:[#allocation9] sm:$0xff]  ;;  %v90_v16 = vld [vmem:[#allocation9 + $0x8] sm:$0xff] }
  0x4e   :  { %80 = vst.msk [vmem:[#allocation2] sm:$0xff] %vm79_vm0, %v78_v12  ;;  %1500 = vmatpush1.bf16.msra.mxu0 %v1861_v8  ;;  %v91_v17 = vld [vmem:[#allocation9 + $0x10] sm:$0xff]  ;;  %v1880_v19 = vpack.c.bf16 %v90_v16, %v89_v15  ;;  %v92_v20 = vld [vmem:[#allocation9 + $0x18] sm:$0xff]  ;;  %v329_v32 = vld [vmem:[#allocation3 + $0x8] sm:$0xff] }
  0x4f   :  { %1502 = vmatprep.subr.bf16.mxu0 %v1863_v9  ;;  %v1885_v21 = vpack.c.bf16 %v92_v20, %v91_v17  ;;  %v170_v22 = vld [vmem:[#allocation3] sm:$0xff]  ;;  %v1900_v27 = vld [vmem:[%s2008_s4] ss:$0 sm:$0xff]  ;;  %v483_v41 = vld [vmem:[#allocation3 + $0x10] sm:$0xff]  ;;  %s1766_s4 = smov [#allocation11]  }
  0x50   :  { %1507 = vmatpush3.bf16.msra.mxu1 %v1880_v19  ;;  %v637_v50 = vld [vmem:[#allocation3 + $0x18] sm:$0xff]  ;;  %v791_v59 = vld [vmem:[#allocation3 + $0x20] sm:$0xff]  ;;  %v945_v6 = vld [vmem:[#allocation3 + $0x28] sm:$0xff]  ;;  %s1338_s19 = sshll.u32 %s1766_s4, 4  ;;  %s1339_s19 = int_to_ptr.vmem [resolvable:$true] %s1338_s19 }
  0x51   :  { %1508 = vmatprep.subr.bf16.mxu1 %v1764_v18  ;;  %v1099_v17 = vld [vmem:[#allocation3 + $0x30] sm:$0xff]  ;;  %s1725_s20 = scalar_lea.vmem %s1339_s19, 1024  ;;  %p1730_p5 = scmp.lt.s32.totalorder %s1339_s19, %s1339_s19 }
  0x52   :  { %1504 = vmatpush1.bf16.msra.mxu0 %v1868_v13  ;;  %p1726_p4 = scmp.ne.s32.totalorder %s1339_s19, %s1725_s20  ;;  %p1731_p6 = scmp.lt.s32.totalorder %s1725_s20, %s1725_s20 }
  0x53   :  { %1512 = vmatprep.subr.bf16.mxu0 %v1859_v4 }
  0x54   :  { %1510 = vmatpush3.bf16.msra.mxu1 %v1885_v21  ;;  %p1732_p7 = por %p1731_p6, %p1730_p5 }
  0x55   :  { %v94_v14 = vld [vmem:[#allocation2] sm:$0xff]  ;;  %1519 = vmatprep.subr.bf16.mxu1 %v1764_v18 }
  0x56   :  { %1352 = vmatmul.mubr.msk.f32.vlgmr.msra.gmra.mrb[0].mxu0 %vm79_vm0, %v94_v14  ;;  %p1733_p8 = pnand %p1732_p7, %p1726_p4 }
  0x57   :  { %1514 = vmatpush1.bf16.msra.mxu0 %v1861_v8  ;;  %321 = vmatprep.mubr.f32.mxu0 %v1763_v0 }
  0x58   :  { %1516 = vmatprep.subr.bf16.mxu0 %v1863_v9 }
  0x5b   :  { %1518 = vmatpush1.bf16.msra.mxu0 %v1868_v13 }
  0x5c   :  { %1526 = vmatprep.subr.bf16.mxu0 %v1859_v4 }
 0x129   :  { %v165_v23 = vpop.f32.mrb[0].mxu0 }
 0x12a   :  { %v167_v24 = vpop.f32.mrb[1].mxu0 }
 0x12b   :  { %v171_v25 = vadd.f32 %v170_v22, %v167_v24 }
 0x12d   :  { %1621 = vtanh.f32 %v171_v25 }
 0x137   :  { %v1622_v26 = vpop.eup %1621 }
 0x138   :  { %1418 = vmatmul.mubr.msk.f32.vlgmr.msra.gmra.mrb[0].mxu1 %vm79_vm0, %v1622_v26  ;;  %v1253_v26 = vld [vmem:[#allocation3 + $0x38] sm:$0xff] }
 0x139   :  { %1521 = vmatpush3.bf16.msra.mxu1 %v1880_v19  ;;  %1428 = vmatprep.mubr.msk.f32.mxu1 %vm1765_vm1, %v1763_v0 }
 0x13a   :  { %1522 = vmatprep.subr.bf16.mxu1 %v1764_v18 }
 0x13d   :  { %1524 = vmatpush3.bf16.msra.mxu1 %v1885_v21 }
 0x13e   :  { %1533 = vmatprep.subr.bf16.mxu1 %v1764_v18 }
 0x20b   :  { %v242_v28 = vpop.f32.mrb[0].mxu1 }
 0x20c   :  { %v243_v29 = vadd.f32 %v242_v28, %v165_v23  ;;  %v1419_v30 = vpop.f32.mrb[1].mxu1 }
 0x20e   :  { %v252_v31 = vadd.f32 %v1900_v27, %v243_v29 }
 0x210   :  { %253 = vst [vmem:[#allocation11] sm:$0xff] %v252_v31  ;;  %1355 = vmatmul.mubr.msk.f32.vlgmr.msra.gmra.mrb[2].mxu0 %vm79_vm0, %v252_v31 }
 0x211   :  { %1528 = vmatpush1.bf16.msra.mxu0 %v1861_v8  ;;  %475 = vmatprep.mubr.f32.mxu0 %v1763_v0 }
 0x212   :  { %1530 = vmatprep.subr.bf16.mxu0 %v1863_v9 }
 0x215   :  { %1532 = vmatpush1.bf16.msra.mxu0 %v1868_v13 }
 0x216   :  { %1540 = vmatprep.subr.bf16.mxu0 %v1859_v4 }
 0x2e3   :  { %v323_v33 = vpop.f32.mrb[2].mxu0 }
 0x2e4   :  { %v325_v34 = vpop.f32.mrb[3].mxu0 }
 0x2e5   :  { %v330_v35 = vadd.f32 %v329_v32, %v325_v34 }
 0x2e7   :  { %1623 = vtanh.f32 %v330_v35 }
 0x2f1   :  { %v1624_v36 = vpop.eup %1623 }
 0x2f2   :  { %1429 = vmatmul.mubr.msk.f32.vlgmr.msra.gmra.mrb[2].mxu1 %vm79_vm0, %v1624_v36 }
 0x2f3   :  { %1535 = vmatpush3.bf16.msra.mxu1 %v1880_v19  ;;  %1439 = vmatprep.mubr.msk.f32.mxu1 %vm1765_vm1, %v1763_v0 }
 0x2f4   :  { %1536 = vmatprep.subr.bf16.mxu1 %v1764_v18 }
 0x2f7   :  { %1538 = vmatpush3.bf16.msra.mxu1 %v1885_v21 }
 0x2f8   :  { %1547 = vmatprep.subr.bf16.mxu1 %v1764_v18 }
 0x3c5   :  { %v401_v37 = vpop.f32.mrb[2].mxu1 }
 0x3c6   :  { %v402_v38 = vadd.f32 %v401_v37, %v323_v33  ;;  %v1430_v39 = vpop.f32.mrb[3].mxu1 }
 0x3c8   :  { %v405_v40 = vadd.f32 %v1900_v27, %v402_v38 }
 0x3ca   :  { %407 = vst [vmem:[#allocation11 + $0x8] sm:$0xff] %v405_v40  ;;  %1357 = vmatmul.mubr.msk.f32.vlgmr.msra.gmra.mrb[4].mxu0 %vm79_vm0, %v405_v40 }
 0x3cb   :  { %1542 = vmatpush1.bf16.msra.mxu0 %v1861_v8  ;;  %629 = vmatprep.mubr.f32.mxu0 %v1763_v0 }
 0x3cc   :  { %1544 = vmatprep.subr.bf16.mxu0 %v1863_v9 }
 0x3cf   :  { %1546 = vmatpush1.bf16.msra.mxu0 %v1868_v13 }
 0x3d0   :  { %1554 = vmatprep.subr.bf16.mxu0 %v1859_v4 }
 0x49d   :  { %v477_v42 = vpop.f32.mrb[4].mxu0 }
 0x49e   :  { %v479_v43 = vpop.f32.mrb[5].mxu0 }
 0x49f   :  { %v484_v44 = vadd.f32 %v483_v41, %v479_v43 }
 0x4a1   :  { %1625 = vtanh.f32 %v484_v44 }
 0x4ab   :  { %v1626_v45 = vpop.eup %1625 }
 0x4ac   :  { %1440 = vmatmul.mubr.msk.f32.vlgmr.msra.gmra.mrb[4].mxu1 %vm79_vm0, %v1626_v45 }
 0x4ad   :  { %1549 = vmatpush3.bf16.msra.mxu1 %v1880_v19  ;;  %1450 = vmatprep.mubr.msk.f32.mxu1 %vm1765_vm1, %v1763_v0 }
 0x4ae   :  { %1550 = vmatprep.subr.bf16.mxu1 %v1764_v18 }
 0x4b1   :  { %1552 = vmatpush3.bf16.msra.mxu1 %v1885_v21 }
 0x4b2   :  { %1561 = vmatprep.subr.bf16.mxu1 %v1764_v18 }
 0x57f   :  { %v555_v46 = vpop.f32.mrb[4].mxu1 }
 0x580   :  { %v556_v47 = vadd.f32 %v555_v46, %v477_v42  ;;  %v1441_v48 = vpop.f32.mrb[5].mxu1 }
 0x582   :  { %v559_v49 = vadd.f32 %v1900_v27, %v556_v47 }
 0x584   :  { %561 = vst [vmem:[#allocation11 + $0x10] sm:$0xff] %v559_v49  ;;  %1359 = vmatmul.mubr.msk.f32.vlgmr.msra.gmra.mrb[6].mxu0 %vm79_vm0, %v559_v49 }
 0x585   :  { %1556 = vmatpush1.bf16.msra.mxu0 %v1861_v8  ;;  %783 = vmatprep.mubr.f32.mxu0 %v1763_v0 }
 0x586   :  { %1558 = vmatprep.subr.bf16.mxu0 %v1863_v9 }
 0x589   :  { %1560 = vmatpush1.bf16.msra.mxu0 %v1868_v13 }
 0x58a   :  { %1568 = vmatprep.subr.bf16.mxu0 %v1859_v4 }
 0x657   :  { %v631_v51 = vpop.f32.mrb[6].mxu0 }
 0x658   :  { %v633_v52 = vpop.f32.mrb[7].mxu0 }
 0x659   :  { %v638_v53 = vadd.f32 %v637_v50, %v633_v52 }
 0x65b   :  { %1627 = vtanh.f32 %v638_v53 }
 0x665   :  { %v1628_v54 = vpop.eup %1627 }
 0x666   :  { %1451 = vmatmul.mubr.msk.f32.vlgmr.msra.gmra.mrb[6].mxu1 %vm79_vm0, %v1628_v54 }
 0x667   :  { %1563 = vmatpush3.bf16.msra.mxu1 %v1880_v19  ;;  %1461 = vmatprep.mubr.msk.f32.mxu1 %vm1765_vm1, %v1763_v0 }
 0x668   :  { %1564 = vmatprep.subr.bf16.mxu1 %v1764_v18 }
 0x66b   :  { %1566 = vmatpush3.bf16.msra.mxu1 %v1885_v21 }
 0x66c   :  { %1575 = vmatprep.subr.bf16.mxu1 %v1764_v18 }
 0x739   :  { %v709_v55 = vpop.f32.mrb[6].mxu1 }
 0x73a   :  { %v710_v56 = vadd.f32 %v709_v55, %v631_v51  ;;  %v1452_v57 = vpop.f32.mrb[7].mxu1 }
 0x73c   :  { %v713_v58 = vadd.f32 %v1900_v27, %v710_v56 }
 0x73e   :  { %715 = vst [vmem:[#allocation11 + $0x18] sm:$0xff] %v713_v58  ;;  %1361 = vmatmul.mubr.msk.f32.vlgmr.msra.gmra.mrb[8].mxu0 %vm79_vm0, %v713_v58 }
 0x73f   :  { %1570 = vmatpush1.bf16.msra.mxu0 %v1861_v8  ;;  %937 = vmatprep.mubr.f32.mxu0 %v1763_v0 }
 0x740   :  { %1572 = vmatprep.subr.bf16.mxu0 %v1863_v9 }
 0x743   :  { %1574 = vmatpush1.bf16.msra.mxu0 %v1868_v13 }
 0x744   :  { %1582 = vmatprep.subr.bf16.mxu0 %v1859_v4 }
 0x811   :  { %v785_v60 = vpop.f32.mrb[8].mxu0 }
 0x812   :  { %v787_v61 = vpop.f32.mrb[9].mxu0 }
 0x813   :  { %v792_v62 = vadd.f32 %v791_v59, %v787_v61 }
 0x815   :  { %1629 = vtanh.f32 %v792_v62 }
 0x81f   :  { %v1630_v63 = vpop.eup %1629 }
 0x820   :  { %1462 = vmatmul.mubr.msk.f32.vlgmr.msra.gmra.mrb[8].mxu1 %vm79_vm0, %v1630_v63 }
 0x821   :  { %1577 = vmatpush3.bf16.msra.mxu1 %v1880_v19  ;;  %1472 = vmatprep.mubr.msk.f32.mxu1 %vm1765_vm1, %v1763_v0 }
 0x822   :  { %1578 = vmatprep.subr.bf16.mxu1 %v1764_v18 }
 0x825   :  { %1580 = vmatpush3.bf16.msra.mxu1 %v1885_v21 }
 0x826   :  { %1589 = vmatprep.subr.bf16.mxu1 %v1764_v18 }
 0x8f3   :  { %v863_v1 = vpop.f32.mrb[8].mxu1 }
 0x8f4   :  { %v864_v2 = vadd.f32 %v863_v1, %v785_v60  ;;  %v1463_v3 = vpop.f32.mrb[9].mxu1 }
 0x8f6   :  { %v867_v5 = vadd.f32 %v1900_v27, %v864_v2 }
 0x8f8   :  { %869 = vst [vmem:[#allocation11 + $0x20] sm:$0xff] %v867_v5  ;;  %1363 = vmatmul.mubr.msk.f32.vlgmr.msra.gmra.mrb[10].mxu0 %vm79_vm0, %v867_v5 }
 0x8f9   :  { %1584 = vmatpush1.bf16.msra.mxu0 %v1861_v8  ;;  %1091 = vmatprep.mubr.f32.mxu0 %v1763_v0 }
 0x8fa   :  { %1586 = vmatprep.subr.bf16.mxu0 %v1863_v9 }
 0x8fd   :  { %1588 = vmatpush1.bf16.msra.mxu0 %v1868_v13 }
 0x8fe   :  { %1596 = vmatprep.subr.bf16.mxu0 %v1859_v4 }
 0x9cb   :  { %v939_v7 = vpop.f32.mrb[10].mxu0 }
 0x9cc   :  { %v941_v10 = vpop.f32.mrb[11].mxu0 }
 0x9cd   :  { %v946_v11 = vadd.f32 %v945_v6, %v941_v10 }
 0x9cf   :  { %1631 = vtanh.f32 %v946_v11 }
 0x9d9   :  { %v1632_v12 = vpop.eup %1631 }
 0x9da   :  { %1473 = vmatmul.mubr.msk.f32.vlgmr.msra.gmra.mrb[10].mxu1 %vm79_vm0, %v1632_v12 }
 0x9db   :  { %1591 = vmatpush3.bf16.msra.mxu1 %v1880_v19  ;;  %1483 = vmatprep.mubr.msk.f32.mxu1 %vm1765_vm1, %v1763_v0 }
 0x9dc   :  { %1592 = vmatprep.subr.bf16.mxu1 %v1764_v18 }
 0x9df   :  { %1594 = vmatpush3.bf16.msra.mxu1 %v1885_v21 }
 0x9e0   :  { %1603 = vmatprep.subr.bf16.mxu1 %v1764_v18 }
 0xaad   :  { %v1017_v4 = vpop.f32.mrb[10].mxu1 }
 0xaae   :  { %v1018_v14 = vadd.f32 %v1017_v4, %v939_v7  ;;  %v1474_v15 = vpop.f32.mrb[11].mxu1 }
 0xab0   :  { %v1021_v16 = vadd.f32 %v1900_v27, %v1018_v14 }
 0xab2   :  { %1023 = vst [vmem:[#allocation11 + $0x28] sm:$0xff] %v1021_v16  ;;  %1365 = vmatmul.mubr.msk.f32.vlgmr.msra.gmra.mrb[12].mxu0 %vm79_vm0, %v1021_v16 }
 0xab3   :  { %1598 = vmatpush1.bf16.msra.mxu0 %v1861_v8  ;;  %1245 = vmatprep.mubr.f32.mxu0 %v1763_v0 }
 0xab4   :  { %1600 = vmatprep.subr.bf16.mxu0 %v1863_v9 }
 0xab7   :  { %1602 = vmatpush1.bf16.msra.mxu0 %v1868_v13 }
 0xb85   :  { %v1093_v20 = vpop.f32.mrb[12].mxu0 }
 0xb86   :  { %v1095_v22 = vpop.f32.mrb[13].mxu0 }
 0xb87   :  { %v1100_v23 = vadd.f32 %v1099_v17, %v1095_v22 }
 0xb89   :  { %1633 = vtanh.f32 %v1100_v23 }
 0xb93   :  { %v1634_v24 = vpop.eup %1633 }
 0xb94   :  { %1484 = vmatmul.mubr.msk.f32.vlgmr.msra.gmra.mrb[12].mxu1 %vm79_vm0, %v1634_v24 }
 0xb95   :  { %1605 = vmatpush3.bf16.msra.mxu1 %v1880_v19  ;;  %1494 = vmatprep.mubr.msk.f32.mxu1 %vm1765_vm1, %v1763_v0 }
 0xb96   :  { %1606 = vmatprep.subr.bf16.mxu1 %v1764_v18 }
 0xb99   :  { %1608 = vmatpush3.bf16.msra.mxu1 %v1885_v21 }
 0xc67   :  { %v1171_v8 = vpop.f32.mrb[12].mxu1 }
 0xc68   :  { %v1172_v9 = vadd.f32 %v1171_v8, %v1093_v20  ;;  %v1485_v13 = vpop.f32.mrb[13].mxu1 }
 0xc6a   :  { %v1175_v25 = vadd.f32 %v1900_v27, %v1172_v9 }
 0xc6c   :  { %1177 = vst [vmem:[#allocation11 + $0x30] sm:$0xff] %v1175_v25  ;;  %1367 = vmatmul.mubr.msk.f32.vlgmr.msra.gmra.mrb[14].mxu0 %vm79_vm0, %v1175_v25 }
 0xd3f   :  { %v1247_v28 = vpop.f32.mrb[14].mxu0 }
 0xd40   :  { %v1249_v29 = vpop.f32.mrb[15].mxu0 }
 0xd41   :  { %v1254_v30 = vadd.f32 %v1253_v26, %v1249_v29 }
 0xd43   :  { %1635 = vtanh.f32 %v1254_v30 }
 0xd4d   :  { %v1636_v19 = vpop.eup %1635 }
 0xd4e   :  { %1495 = vmatmul.mubr.msk.f32.vlgmr.msra.gmra.mrb[14].mxu1 %vm79_vm0, %v1636_v19 }
 0xe21   :  { %v1325_v0 = vpop.f32.mrb[14].mxu1 }
 0xe22   :  { %v1326_v18 = vadd.f32 %v1325_v0, %v1247_v28  ;;  %v1496_v21 = vpop.f32.mrb[15].mxu1 }
 0xe24   :  { %v1329_v31 = vadd.f32 %v1900_v27, %v1326_v18 }
 0xe26   :  { %1331 = vst [vmem:[#allocation11 + $0x38] sm:$0xff] %v1329_v31  ;;  %1332 = vst.msk [vmem:[#allocation2] sm:$0xff] %vm79_vm0, %v1329_v31 }
 0xe27   :  { %1736 = shalt.err (!%p1733_p8)
}
 0xe28   :  { %s1737_s24 = scalar_lea.hbm %s2009_s5, 1024 }
 0xe29   :  { %p1738_p9 = scmp.ne.s32.totalorder %s2009_s5, %s1737_s24  ;;  %p1741_p10 = scmp.lt.u32.totalorder %s1737_s24, %s2009_s5 }
 0xe2b   :  { %p1743_p11 = pnand %p1741_p10, %p1738_p9 }
 0xe2d   :  { %1746 = shalt.err (!%p1743_p11)
}
 0xe2e   :  { %1344 = dma.vmem_to_hbm [thread:$0]  %s1339_s19, 1024, %s2009_s5, [#allocation5], %s1757_s1, %s1757_s1, %s1758_s15  }
 0xe2f   :  { %1753 = dma.done.wait [#allocation5], 1024  }
 0xe30   :  { %1754 = vsyncadd [#allocation5], 4294966272 }
 0xe31   :  { %1348 = vsyncpa [#allocation4], 1 }
 0xe32   :  { %1349 = vsyncpa [#allocation7], 1 }
 0xe33   :  { %1350 = vsyncpa [#allocation10], 1 }
 0xe34   :  { %1351 = vsyncpa [#allocation5], 1 }

</bundles_post_ra>
